<compile_context>
chip_gen: v6e
topology: v6e:2x2x1
jax: 0.10.0
libtpu: 0.0.40
codegen_flags: <defaults>
</compile_context>

<pallas_src>
import functools
import math
import numpy as np
import jax
import jax.numpy as jnp
from jax.experimental import pallas as pl
from jax.experimental.pallas import tpu as pltpu


# ----------------------------------------------------------------------------
# gen_grid_up (host-side setup, identical semantics to the PyTorch helper)
# ----------------------------------------------------------------------------
def gen_grid_up(up_ratio, grid_size=0.2):
    sqrted = int(math.sqrt(up_ratio)) + 1
    num_x, num_y = 1, up_ratio
    for i in reversed(range(1, sqrted + 1)):
        if up_ratio % i == 0:
            num_x, num_y = i, up_ratio // i
            break
    grid_x = np.linspace(-grid_size, grid_size, num_x)
    grid_y = np.linspace(-grid_size, grid_size, num_y)
    xg, yg = np.meshgrid(grid_x, grid_y, indexing="ij")
    grid = np.stack([xg, yg], axis=-1).reshape(-1, 2).T.astype(np.float32)  # (2, up_ratio)
    return jnp.asarray(grid)


# ----------------------------------------------------------------------------
# Hardware-aware helpers
# ----------------------------------------------------------------------------
def _vmem_budget_bytes(frac=0.75, default_cap=64 * 1024 * 1024):
    """~75% of physical VMEM (v5e/v6e: 128 MiB, v7x: 64 MiB); safe fallback."""
    try:
        cap = int(pltpu.get_tpu_info().vmem_capacity_bytes)
    except Exception:
        cap = default_cap
    return int(cap * frac)


def _default_point_on_mxu():
    """v6e/v7x: fold the conv1 point term into the MXU (kernel is VALU-bound
    there); v5e: keep it on the VPU as free filler under the slower MXU."""
    try:
        info = pltpu.get_tpu_info()
        name = str(getattr(info, "chip_version", getattr(info, "version", ""))).lower()
        if "v5" in name or "5e" in name:
            return False
        return True
    except Exception:
        return True


def _spec(block_shape, index_map, *, single=False):
    """BlockSpec; constant-index inputs get pipeline_mode=pl.Buffered(1)
    (single-buffered — double-buffering buys nothing when the index never
    changes).  Falls back to a plain BlockSpec if the API is unavailable."""
    if single:
        try:
            return pl.BlockSpec(block_shape, index_map, pipeline_mode=pl.Buffered(1))
        except Exception:
            pass
    return pl.BlockSpec(block_shape, index_map)


def _pick_point_tile(num_fine, scale, hidden, cd_bytes, vmem_budget):
    """Largest lane-friendly T that (a) divides num_fine, (b) is a multiple of
    `scale` (grid-pattern period) and 128, (c) fits the per-tile VMEM estimate,
    and (d) leaves >= 2 tiles so the leading parallel grid axis can split
    across 2 TensorCores on v7x."""
    cap = min(num_fine, 8192)
    if num_fine >= 256:
        cap = min(cap, num_fine // 2)          # keep >= 2 tiles for megacore
    budget = vmem_budget // 2                  # headroom for weights / pipeline

    def fits(t):
        per_tile = (hidden * t * cd_bytes      # gc_tile (single-buffered)
                    + 2 * hidden * t * 4       # h / h2 f32 intermediates
                    + 2 * (4 + 3) * t * 4)     # double-buffered p4 + out tiles
        return per_tile <= budget

    t = cap - (cap % 128)
    while t >= 128:
        if num_fine % t == 0 and t % scale == 0 and fits(t):
            return t
        t -= 128
    return num_fine                            # single tile fallback (full extent)


# ----------------------------------------------------------------------------
# Kernel 1: coarse MLP (fc1 -> relu -> fc2 -> relu -> fc3), single shot.
# Also emits the hoisted fine-path per-batch bias:
#   bias1 = x @ conv1_w[global rows] + conv1_b        (shape (B, H))
# ----------------------------------------------------------------------------
def _coarse_kernel(x_ref, w1_ref, b1_ref, w2_ref, b2_ref, w3_ref, b3_ref,
                   wx_ref, cb1_ref, coarse_ref, bias1_ref):
    f32 = jnp.float32
    x = x_ref[...]
    h = jnp.dot(x, w1_ref[...], preferred_element_type=f32) + b1_ref[...]
    h = jnp.maximum(h, 0.0).astype(x.dtype)
    h = jnp.dot(h, w2_ref[...], preferred_element_type=f32) + b2_ref[...]
    h = jnp.maximum(h, 0.0).astype(x.dtype)
    coarse_ref[...] = (jnp.dot(h, w3_ref[...], preferred_element_type=f32)
                       + b3_ref[...]).astype(coarse_ref.dtype)
    # Hoisted conv1 global-feature term of the fine path (done once per batch
    # here instead of once per (batch, point-tile) in the fine kernel).
    bias1_ref[...] = (jnp.dot(x, wx_ref[...], preferred_element_type=f32)
                      + cb1_ref[...]).astype(bias1_ref.dtype)


# ----------------------------------------------------------------------------
# Kernel 2: fine path, channels-first per (point-tile, batch):
#   conv1 = precomputed grid term (H,T)
#           + [point term + per-batch bias]  (MXU K=4 dot, or VPU FMAs on v5e)
#   fine  = W3^T @ relu(W2^T @ relu(conv1)) + b3 + center       -> (3, T) NCW
# ----------------------------------------------------------------------------
def _fine_kernel(gc_ref, p4_ref, lhs4_ref, w2t_ref, b2_ref, w3t_ref, b3_ref,
                 out_ref, *, point_on_mxu):
    f32 = jnp.float32
    p4 = p4_ref[0].astype(f32)        # (4, T): rows 0..2 = center xyz, row 3 = ones
    lhs = lhs4_ref[0]                 # (H, 4): cols 0..2 = conv1 point rows^T, col 3 = bias1
    gc = gc_ref[...].astype(f32)      # (H, T): precomputed conv1 grid term

    if point_on_mxu:
        # v6e/v7x: one tiny-K MXU matmul folds point term + per-batch bias.
        h = gc + jnp.dot(lhs, p4, preferred_element_type=f32)
    else:
        # v5e: MXU binds; keep the point term as free VPU filler.
        h = gc + lhs[:, 3:4]
        for c in range(3):
            h = h + lhs[:, c:c + 1] * p4[c:c + 1, :]   # (H,1)*(1,T) broadcast FMA
    h = jnp.maximum(h, 0.0).astype(w2t_ref.dtype)

    # conv2 (channels-first: (H,H) @ (H,T)) + relu
    h2 = jnp.dot(w2t_ref[...], h, preferred_element_type=f32) + b2_ref[...]
    h2 = jnp.maximum(h2, 0.0).astype(w3t_ref.dtype)

    # conv3 -> (3, T): lane-dense NCW; add center residual and store.
    fine = (jnp.dot(w3t_ref[...], h2, preferred_element_type=f32)
            + b3_ref[...] + p4[:3, :])
    out_ref[...] = fine[None].astype(out_ref.dtype)


# ----------------------------------------------------------------------------
# Wrapper
# ----------------------------------------------------------------------------
def decoder_forward(params, x, grid, *, num_coarse, num_fine, scale,
                    tile_pts=None, compute_dtype=jnp.bfloat16, point_on_mxu=None):
    B, D = x.shape
    H = params["conv2_w"].shape[0]
    N3 = 3 * num_coarse
    cd = compute_dtype
    f32 = jnp.float32

    # conv1 row-split assumes the concat order [grid(2), point(3), global(D)].
    assert params["conv1_w"].shape[0] == 2 + 3 + D, (
        "conv1_w rows must follow the concat order [grid(2), point(3), global(D)]")
    assert num_fine == num_coarse * scale

    if point_on_mxu is None:
        point_on_mxu = _default_point_on_mxu()
    vmem_cap = _vmem_budget_bytes()

    # ---- one-time parameter preprocessing (wrapper-side XLA glue) ----
    # Big weights -> compute dtype; ALL biases stay f32 (added to f32 accumulators).
    w1 = params["fc1_w"].astype(cd);  b1 = params["fc1_b"].astype(f32)
    w2 = params["fc2_w"].astype(cd);  b2 = params["fc2_b"].astype(f32)
    w3 = params["fc3_w"].astype(cd);  b3 = params["fc3_b"].astype(f32)
    wg = params["conv1_w"][:2].astype(f32)              # (2, H)  grid rows
    wp = params["conv1_w"][2:5].astype(f32)             # (3, H)  point rows
    wx = params["conv1_w"][5:].astype(cd)               # (D, H)  global rows
    cb1 = params["conv1_b"].astype(f32)                 # (1, H)
    w2t = jnp.transpose(params["conv2_w"]).astype(cd)   # (H, H)
    b2c = params["conv2_b"].reshape(H, 1).astype(f32)   # (H, 1)
    w3t = jnp.transpose(params["conv3_w"]).astype(cd)   # (3, H)
    b3c = params["conv3_b"].reshape(3, 1).astype(f32)   # (3, 1)
    x_cd = x.astype(cd)

    # ---- coarse MLP (+ hoisted fine-path global term), single-shot kernel ----
    coarse_inputs = (x_cd, w1, b1, w2, b2, w3, b3, wx, cb1)
    coarse_flat, bias1 = pl.pallas_call(
        _coarse_kernel,
        out_shape=(jax.ShapeDtypeStruct((B, N3), f32),
                   jax.ShapeDtypeStruct((B, H), f32)),
        grid=(1,),
        in_specs=[_spec(a.shape, lambda i: (0, 0), single=True)
                  for a in coarse_inputs],
        out_specs=(pl.BlockSpec((B, N3), lambda i: (0, 0)),
                   pl.BlockSpec((B, H), lambda i: (0, 0))),
        compiler_params=pltpu.CompilerParams(
            dimension_semantics=("arbitrary",),
            vmem_limit_bytes=vmem_cap),
    )(*coarse_inputs)

    # torch: .view(-1, 3, num_coarse)  -> NCW, kept f32
    coarse = coarse_flat.reshape(B, 3, num_coarse)

    # center / point_feat in NCW (each coarse point repeated `scale` times),
    # plus a ones row so the per-batch bias rides the same K=4 matmul.
    point_ncw = jnp.repeat(coarse, scale, axis=2)                  # (B, 3, num_fine)
    p4 = jnp.concatenate(
        [point_ncw, jnp.ones((B, 1, num_fine), f32)], axis=1)      # (B, 4, num_fine)

    # (H, 4) per-batch LHS: conv1 point rows^T | hoisted global term (incl. bias)
    lhs4 = jnp.concatenate(
        [jnp.broadcast_to(jnp.transpose(wp)[None], (B, H, 3)),
         bias1[:, :, None]], axis=2)                               # (B, H, 4) f32

    # point tile (generation/VMEM aware, >= 2 tiles for v7x megacore)
    cd_bytes = jnp.dtype(cd).itemsize
    T = (tile_pts if tile_pts is not None
         else _pick_point_tile(num_fine, scale, H, cd_bytes, vmem_cap))
    assert num_fine % T == 0 and T % scale == 0
    n_tiles = num_fine // T

    # conv1 grid contribution: only `scale` distinct grid columns, so the K=2
    # matmul is done once here and tiled to one point-tile (valid because
    # T % scale == 0 and tiles start at multiples of T).
    gc = jnp.dot(jnp.transpose(wg), grid.astype(f32))              # (H, scale)
    gc_tile = jnp.tile(gc, (1, T // scale)).astype(cd)             # (H, T) compute dtype

    fine = pl.pallas_call(
        functools.partial(_fine_kernel, point_on_mxu=point_on_mxu),
        out_shape=jax.ShapeDtypeStruct((B, 3, num_fine), f32),
        grid=(n_tiles, B),                                         # tiles outermost
        in_specs=[
            _spec((H, T), lambda i, b: (0, 0), single=True),       # grid term (resident)
            pl.BlockSpec((1, 4, T), lambda i, b: (b, 0, i)),       # [center xyz; ones]
            pl.BlockSpec((1, H, 4), lambda i, b: (b, 0, 0)),       # [point rows^T | bias1]
            _spec((H, H), lambda i, b: (0, 0), single=True),       # conv2 weight^T
            _spec((H, 1), lambda i, b: (0, 0), single=True),       # conv2 bias (f32)
            _spec((3, H), lambda i, b: (0, 0), single=True),       # conv3 weight^T
            _spec((3, 1), lambda i, b: (0, 0), single=True),       # conv3 bias (f32)
        ],
        out_specs=pl.BlockSpec((1, 3, T), lambda i, b: (b, 0, i)),  # lane-dense NCW
        compiler_params=pltpu.CompilerParams(
            dimension_semantics=("parallel", "parallel"),
            vmem_limit_bytes=vmem_cap),
    )(gc_tile, p4, lhs4, w2t, b2c, w3t, b3c)

    return coarse, fine


# ----------------------------------------------------------------------------
# Pure-JAX reference (mirrors the PyTorch forward) for the correctness check
# ----------------------------------------------------------------------------
def decoder_ref(params, x, grid, *, num_coarse, num_fine, scale):
    B = x.shape[0]
    h = jax.nn.relu(x @ params["fc1_w"] + params["fc1_b"])
    h = jax.nn.relu(h @ params["fc2_w"] + params["fc2_b"])
    coarse = (h @ params["fc3_w"] + params["fc3_b"]).reshape(B, 3, num_coarse)
    grid_feat = jnp.tile(grid[None], (B, 1, num_coarse))                       # (B,2,NF)
    point_feat = jnp.repeat(jnp.transpose(coarse, (0, 2, 1)), scale, axis=1)   # (B,NF,3)
    point_feat = jnp.transpose(point_feat, (0, 2, 1))                          # (B,3,NF)
    global_feat = jnp.tile(x[:, :, None], (1, 1, num_fine))                    # (B,D,NF)
    feat = jnp.concatenate([grid_feat, point_feat, global_feat], axis=1)       # (B,Ccat,NF)
    f = jnp.transpose(feat, (0, 2, 1))
    h1 = jax.nn.relu(f @ params["conv1_w"] + params["conv1_b"])
    h2 = jax.nn.relu(h1 @ params["conv2_w"] + params["conv2_b"])
    out = h2 @ params["conv3_w"] + params["conv3_b"]
    fine = jnp.transpose(out, (0, 2, 1)) + point_feat
    return coarse, fine


if __name__ == "__main__":
    B, D = 2, 128
    num_coarse, scale = 64, 4
    num_fine = num_coarse * scale
    H = 128
    Ccat = 2 + 3 + D   # 133, analogous to 1029 = 2 + 3 + 1024

    key = jax.random.PRNGKey(0)
    keys = jax.random.split(key, 13)

    def w(k, shape, s=0.05):
        return jax.random.normal(k, shape, dtype=jnp.float32) * s

    params = {
        "fc1_w": w(keys[0], (D, D)),
        "fc1_b": w(keys[1], (1, D), 0.01),
        "fc2_w": w(keys[2], (D, D)),
        "fc2_b": w(keys[3], (1, D), 0.01),
        "fc3_w": w(keys[4], (D, 3 * num_coarse)),
        "fc3_b": w(keys[5], (1, 3 * num_coarse), 0.01),
        "conv1_w": w(keys[6], (Ccat, H)),
        "conv1_b": w(keys[7], (1, H), 0.01),
        "conv2_w": w(keys[8], (H, H)),
        "conv2_b": w(keys[9], (1, H), 0.01),
        "conv3_w": w(keys[10], (H, 3)),
        "conv3_b": w(keys[11], (1, 3), 0.01),
    }
    x = jax.random.normal(keys[12], (B, D), dtype=jnp.float32)
    assert 2 ** int(math.log2(scale)) == scale, "module requires power-of-two scale"
    grid = gen_grid_up(scale, 0.05)   # (2, scale)

    coarse_r, fine_r = decoder_ref(params, x, grid, num_coarse=num_coarse,
                                   num_fine=num_fine, scale=scale)

    # float32, MXU point-term path (v6e/v7x codepath)
    coarse, fine = decoder_forward(params, x, grid, num_coarse=num_coarse,
                                   num_fine=num_fine, scale=scale,
                                   compute_dtype=jnp.float32, point_on_mxu=True)
    jax.block_until_ready((coarse, fine))
    assert coarse.shape == (B, 3, num_coarse) and fine.shape == (B, 3, num_fine)
    np.testing.assert_allclose(np.asarray(coarse), np.asarray(coarse_r), rtol=1e-2, atol=1e-3)
    np.testing.assert_allclose(np.asarray(fine), np.asarray(fine_r), rtol=1e-2, atol=1e-3)

    # float32, VPU point-term path (v5e codepath)
    coarse_v, fine_v = decoder_forward(params, x, grid, num_coarse=num_coarse,
                                       num_fine=num_fine, scale=scale,
                                       compute_dtype=jnp.float32, point_on_mxu=False)
    jax.block_until_ready((coarse_v, fine_v))
    np.testing.assert_allclose(np.asarray(coarse_v), np.asarray(coarse_r), rtol=1e-2, atol=1e-3)
    np.testing.assert_allclose(np.asarray(fine_v), np.asarray(fine_r), rtol=1e-2, atol=1e-3)

    # default path: bf16 weights/activations, f32 accumulation, auto MXU/VPU choice
    coarse_bf, fine_bf = decoder_forward(params, x, grid, num_coarse=num_coarse,
                                         num_fine=num_fine, scale=scale)
    jax.block_until_ready((coarse_bf, fine_bf))
    np.testing.assert_allclose(np.asarray(coarse_bf), np.asarray(coarse_r), rtol=5e-2, atol=3e-2)
    np.testing.assert_allclose(np.asarray(fine_bf), np.asarray(fine_r), rtol=5e-2, atol=3e-2)

    print("KERNEL_OK")
</pallas_src>

<mosaic_0001>
module attributes {stable_mosaic.version = 11 : i64} {
  func.func @_coarse_kernel(%arg0: i32, %arg1: memref<2x128xf32, #tpu.memory_space<vmem>>, %arg2: memref<128x128xf32, #tpu.memory_space<vmem>>, %arg3: memref<1x128xf32, #tpu.memory_space<vmem>>, %arg4: memref<128x128xf32, #tpu.memory_space<vmem>>, %arg5: memref<1x128xf32, #tpu.memory_space<vmem>>, %arg6: memref<128x192xf32, #tpu.memory_space<vmem>>, %arg7: memref<1x192xf32, #tpu.memory_space<vmem>>, %arg8: memref<128x128xf32, #tpu.memory_space<vmem>>, %arg9: memref<1x128xf32, #tpu.memory_space<vmem>>, %arg10: memref<2x192xf32, #tpu.memory_space<vmem>>, %arg11: memref<2x128xf32, #tpu.memory_space<vmem>>) attributes {dimension_semantics = [#tpu.dimension_semantics<arbitrary>], iteration_bounds = array<i64: 1>, scalar_prefetch = 0 : i64, scratch_operands = 0 : i64, tpu.core_type = #tpu.core_type<tc>, window_params = [{pipeline_mode = #tpu.pipeline_mode<synchronous>, transform_indices = @transform_0, window_bounds = array<i64: 2, 128>}, {pipeline_mode = #tpu.pipeline_mode<synchronous>, transform_indices = @transform_1, window_bounds = array<i64: 128, 128>}, {pipeline_mode = #tpu.pipeline_mode<synchronous>, transform_indices = @transform_2, window_bounds = array<i64: 1, 128>}, {pipeline_mode = #tpu.pipeline_mode<synchronous>, transform_indices = @transform_3, window_bounds = array<i64: 128, 128>}, {pipeline_mode = #tpu.pipeline_mode<synchronous>, transform_indices = @transform_4, window_bounds = array<i64: 1, 128>}, {pipeline_mode = #tpu.pipeline_mode<synchronous>, transform_indices = @transform_5, window_bounds = array<i64: 128, 192>}, {pipeline_mode = #tpu.pipeline_mode<synchronous>, transform_indices = @transform_6, window_bounds = array<i64: 1, 192>}, {pipeline_mode = #tpu.pipeline_mode<synchronous>, transform_indices = @transform_7, window_bounds = array<i64: 128, 128>}, {pipeline_mode = #tpu.pipeline_mode<synchronous>, transform_indices = @transform_8, window_bounds = array<i64: 1, 128>}, {pipeline_mode = #tpu.pipeline_mode<synchronous>, transform_indices = @transform_9, window_bounds = array<i64: 2, 192>}, {pipeline_mode = #tpu.pipeline_mode<synchronous>, transform_indices = @transform_10, window_bounds = array<i64: 2, 128>}]} {
    %c0 = arith.constant 0 : index
    %c0_0 = arith.constant 0 : index
    %0 = vector.load %arg1[%c0, %c0_0] : memref<2x128xf32, #tpu.memory_space<vmem>>, vector<2x128xf32>
    %c0_1 = arith.constant 0 : index
    %c0_2 = arith.constant 0 : index
    %1 = vector.load %arg2[%c0_1, %c0_2] : memref<128x128xf32, #tpu.memory_space<vmem>>, vector<128x128xf32>
    %cst = arith.constant dense<0.000000e+00> : vector<2x128xf32>
    %2 = tpu.matmul %0, %1, %cst {dimension_numbers = #tpu.dot_dimension_numbers<[1], [0], [0], [1], [0, 0, 1, 1], [], []>} : vector<2x128xf32>, vector<128x128xf32>, vector<2x128xf32> -> vector<2x128xf32>
    %c0_3 = arith.constant 0 : index
    %c0_4 = arith.constant 0 : index
    %3 = vector.load %arg3[%c0_3, %c0_4] : memref<1x128xf32, #tpu.memory_space<vmem>>, vector<1x128xf32>
    %4 = vector.broadcast %3 : vector<1x128xf32> to vector<2x128xf32>
    %5 = arith.addf %2, %4 : vector<2x128xf32>
    %cst_5 = arith.constant 0.000000e+00 : f32
    %6 = vector.broadcast %cst_5 : f32 to vector<2x128xf32>
    %7 = arith.maximumf %5, %6 : vector<2x128xf32>
    %c0_6 = arith.constant 0 : index
    %c0_7 = arith.constant 0 : index
    %8 = vector.load %arg4[%c0_6, %c0_7] : memref<128x128xf32, #tpu.memory_space<vmem>>, vector<128x128xf32>
    %cst_8 = arith.constant dense<0.000000e+00> : vector<2x128xf32>
    %9 = tpu.matmul %7, %8, %cst_8 {dimension_numbers = #tpu.dot_dimension_numbers<[1], [0], [0], [1], [0, 0, 1, 1], [], []>} : vector<2x128xf32>, vector<128x128xf32>, vector<2x128xf32> -> vector<2x128xf32>
    %c0_9 = arith.constant 0 : index
    %c0_10 = arith.constant 0 : index
    %10 = vector.load %arg5[%c0_9, %c0_10] : memref<1x128xf32, #tpu.memory_space<vmem>>, vector<1x128xf32>
    %11 = vector.broadcast %10 : vector<1x128xf32> to vector<2x128xf32>
    %12 = arith.addf %9, %11 : vector<2x128xf32>
    %cst_11 = arith.constant 0.000000e+00 : f32
    %13 = vector.broadcast %cst_11 : f32 to vector<2x128xf32>
    %14 = arith.maximumf %12, %13 : vector<2x128xf32>
    %c0_12 = arith.constant 0 : index
    %c0_13 = arith.constant 0 : index
    %15 = vector.load %arg6[%c0_12, %c0_13] : memref<128x192xf32, #tpu.memory_space<vmem>>, vector<128x192xf32>
    %cst_14 = arith.constant dense<0.000000e+00> : vector<2x192xf32>
    %16 = tpu.matmul %14, %15, %cst_14 {dimension_numbers = #tpu.dot_dimension_numbers<[1], [0], [0], [1], [0, 0, 1, 1], [], []>} : vector<2x128xf32>, vector<128x192xf32>, vector<2x192xf32> -> vector<2x192xf32>
    %c0_15 = arith.constant 0 : index
    %c0_16 = arith.constant 0 : index
    %17 = vector.load %arg7[%c0_15, %c0_16] : memref<1x192xf32, #tpu.memory_space<vmem>>, vector<1x192xf32>
    %18 = vector.broadcast %17 : vector<1x192xf32> to vector<2x192xf32>
    %19 = arith.addf %16, %18 : vector<2x192xf32>
    %c0_17 = arith.constant 0 : index
    %c0_18 = arith.constant 0 : index
    %20 = vector.load %arg10[%c0_17, %c0_18] : memref<2x192xf32, #tpu.memory_space<vmem>>, vector<2x192xf32>
    tpu.vector_store %arg10[%c0_17, %c0_18], %19 {strides = array<i32>} : memref<2x192xf32, #tpu.memory_space<vmem>>, vector<2x192xf32>,
    %c0_19 = arith.constant 0 : index
    %c0_20 = arith.constant 0 : index
    %21 = vector.load %arg8[%c0_19, %c0_20] : memref<128x128xf32, #tpu.memory_space<vmem>>, vector<128x128xf32>
    %cst_21 = arith.constant dense<0.000000e+00> : vector<2x128xf32>
    %22 = tpu.matmul %0, %21, %cst_21 {dimension_numbers = #tpu.dot_dimension_numbers<[1], [0], [0], [1], [0, 0, 1, 1], [], []>} : vector<2x128xf32>, vector<128x128xf32>, vector<2x128xf32> -> vector<2x128xf32>
    %c0_22 = arith.constant 0 : index
    %c0_23 = arith.constant 0 : index
    %23 = vector.load %arg9[%c0_22, %c0_23] : memref<1x128xf32, #tpu.memory_space<vmem>>, vector<1x128xf32>
    %24 = vector.broadcast %23 : vector<1x128xf32> to vector<2x128xf32>
    %25 = arith.addf %22, %24 : vector<2x128xf32>
    %c0_24 = arith.constant 0 : index
    %c0_25 = arith.constant 0 : index
    %26 = vector.load %arg11[%c0_24, %c0_25] : memref<2x128xf32, #tpu.memory_space<vmem>>, vector<2x128xf32>
    tpu.vector_store %arg11[%c0_24, %c0_25], %25 {strides = array<i32>} : memref<2x128xf32, #tpu.memory_space<vmem>>, vector<2x128xf32>,
    return
  }
  func.func @transform_0(%arg0: i32) -> (i32, i32) {
    %c0_i32 = arith.constant 0 : i32
    %c0_i32_0 = arith.constant 0 : i32
    %c0_i32_1 = arith.constant 0 : i32
    return %c0_i32, %c0_i32_0 : i32, i32
  }
  func.func @transform_1(%arg0: i32) -> (i32, i32) {
    %c0_i32 = arith.constant 0 : i32
    %c0_i32_0 = arith.constant 0 : i32
    %c0_i32_1 = arith.constant 0 : i32
    return %c0_i32, %c0_i32_0 : i32, i32
  }
  func.func @transform_2(%arg0: i32) -> (i32, i32) {
    %c0_i32 = arith.constant 0 : i32
    %c0_i32_0 = arith.constant 0 : i32
    %c0_i32_1 = arith.constant 0 : i32
    return %c0_i32, %c0_i32_0 : i32, i32
  }
  func.func @transform_3(%arg0: i32) -> (i32, i32) {
    %c0_i32 = arith.constant 0 : i32
    %c0_i32_0 = arith.constant 0 : i32
    %c0_i32_1 = arith.constant 0 : i32
    return %c0_i32, %c0_i32_0 : i32, i32
  }
  func.func @transform_4(%arg0: i32) -> (i32, i32) {
    %c0_i32 = arith.constant 0 : i32
    %c0_i32_0 = arith.constant 0 : i32
    %c0_i32_1 = arith.constant 0 : i32
    return %c0_i32, %c0_i32_0 : i32, i32
  }
  func.func @transform_5(%arg0: i32) -> (i32, i32) {
    %c0_i32 = arith.constant 0 : i32
    %c0_i32_0 = arith.constant 0 : i32
    %c0_i32_1 = arith.constant 0 : i32
    return %c0_i32, %c0_i32_0 : i32, i32
  }
  func.func @transform_6(%arg0: i32) -> (i32, i32) {
    %c0_i32 = arith.constant 0 : i32
    %c0_i32_0 = arith.constant 0 : i32
    %c0_i32_1 = arith.constant 0 : i32
    return %c0_i32, %c0_i32_0 : i32, i32
  }
  func.func @transform_7(%arg0: i32) -> (i32, i32) {
    %c0_i32 = arith.constant 0 : i32
    %c0_i32_0 = arith.constant 0 : i32
    %c0_i32_1 = arith.constant 0 : i32
    return %c0_i32, %c0_i32_0 : i32, i32
  }
  func.func @transform_8(%arg0: i32) -> (i32, i32) {
    %c0_i32 = arith.constant 0 : i32
    %c0_i32_0 = arith.constant 0 : i32
    %c0_i32_1 = arith.constant 0 : i32
    return %c0_i32, %c0_i32_0 : i32, i32
  }
  func.func @transform_9(%arg0: i32) -> (i32, i32) {
    %c0_i32 = arith.constant 0 : i32
    %c0_i32_0 = arith.constant 0 : i32
    %c0_i32_1 = arith.constant 0 : i32
    return %c0_i32, %c0_i32_0 : i32, i32
  }
  func.func @transform_10(%arg0: i32) -> (i32, i32) {
    %c0_i32 = arith.constant 0 : i32
    %c0_i32_0 = arith.constant 0 : i32
    %c0_i32_1 = arith.constant 0 : i32
    return %c0_i32, %c0_i32_0 : i32, i32
  }
}

</mosaic_0001>

<bundles_post_ra>
// kernel: tpu_custom_call.1
= control target key start
LH: loop header
LB: loop body
LE: loop exit
PB: predicated region body
PF: predicated region fallthrough
CT: control target
= control target key end

     0   :  { %16 = vsyncpa [#allocation3], 0  ;;  %v685_v1 = vmov 0.0   ;;  %vm686_vm0 = vmmov 0   ;;  %s1065_s0 = inlined_call_operand.vmem [shape: f32[2,128], index: 0, kind: input, shape index: {}]   ;;  %s1066_s1 = inlined_call_operand.vmem [shape: f32[128,128], index: 1, kind: input, shape index: {}]   ;;  %s1067_s2 = inlined_call_operand.vmem [shape: f32[1,128], index: 2, kind: input, shape index: {}]   ;;  %s1068_s3 = inlined_call_operand.vmem [shape: f32[128,128], index: 3, kind: input, shape index: {}]   ;;  %s1069_s4 = inlined_call_operand.vmem [shape: f32[1,128], index: 4, kind: input, shape index: {}]   ;;  %s1070_s5 = inlined_call_operand.vmem [shape: f32[128,192], index: 5, kind: input, shape index: {}]   ;;  %s1071_s6 = inlined_call_operand.vmem [shape: f32[1,192], index: 6, kind: input, shape index: {}]   ;;  %s1072_s7 = inlined_call_operand.vmem [shape: f32[128,128], index: 7, kind: input, shape index: {}]   ;;  %s1073_s8 = inlined_call_operand.vmem [shape: f32[1,128], index: 8, kind: input, shape index: {}]   ;;  %s1074_s9 = inlined_call_operand.hbm [shape: f32[2,192], index: 9, kind: output, shape index: {0}]   ;;  %s1075_s10 = inlined_call_operand.hbm [shape: f32[2,128], index: 10, kind: output, shape index: {1}]  }
   0x1   :  { %v52_v0 = vld [vmem:[%s1066_s1 + $0x78] sm:$0xff]  ;;  %531 = vmatprep.subr.mxu0 %v685_v1  ;;  %v51_v2 = vld [vmem:[%s1066_s1 + $0x70] sm:$0xff]  ;;  %563 = vmatprep.mubr.msk.f32.mxu0 %vm686_vm0, %v685_v1  ;;  %v50_v3 = vld [vmem:[%s1066_s1 + $0x68] sm:$0xff] }
   0x2   :  { %532 = vmatpush3.msra.mxu0 %v52_v0  ;;  %566 = vmatprep.subr.mxu1 %v685_v1  ;;  %v49_v4 = vld [vmem:[%s1066_s1 + $0x60] sm:$0xff]  ;;  %v146_v5 = vld [vmem:[%s1068_s3 + $0x78] sm:$0xff]  ;;  %v145_v6 = vld [vmem:[%s1068_s3 + $0x70] sm:$0xff] }
   0x3   :  { %533 = vmatprep.subr.mxu0 %v685_v1  ;;  %598 = vmatprep.mubr.msk.f32.mxu1 %vm686_vm0, %v685_v1  ;;  %v48_v7 = vld [vmem:[%s1066_s1 + $0x58] sm:$0xff]  ;;  %v144_v8 = vld [vmem:[%s1068_s3 + $0x68] sm:$0xff]  ;;  %v47_v9 = vld [vmem:[%s1066_s1 + $0x50] sm:$0xff] }
   0x4   :  { %534 = vmatpush3.msra.mxu0 %v51_v2  ;;  %567 = vmatpush3.msra.mxu1 %v146_v5  ;;  %v143_v10 = vld [vmem:[%s1068_s3 + $0x60] sm:$0xff] }
   0x5   :  { %535 = vmatprep.subr.mxu0 %v685_v1  ;;  %568 = vmatprep.subr.mxu1 %v685_v1 }
   0x6   :  { %536 = vmatpush3.msra.mxu0 %v50_v3  ;;  %569 = vmatpush3.msra.mxu1 %v145_v6 }
   0x7   :  { %537 = vmatprep.subr.mxu0 %v685_v1  ;;  %570 = vmatprep.subr.mxu1 %v685_v1 }
   0x8   :  { %538 = vmatpush3.msra.mxu0 %v49_v4  ;;  %571 = vmatpush3.msra.mxu1 %v144_v8 }
   0x9   :  { %539 = vmatprep.subr.mxu0 %v685_v1 }
   0xa   :  { %540 = vmatpush3.msra.mxu0 %v48_v7 }
   0xb   :  { %17 = vsyncpa [#allocation5], 0  ;;  %541 = vmatprep.subr.mxu0 %v685_v1  ;;  %v46_v11 = vld [vmem:[%s1066_s1 + $0x48] sm:$0xff]  ;;  %572 = vmatprep.subr.mxu1 %v685_v1  ;;  %v142_v12 = vld [vmem:[%s1068_s3 + $0x58] sm:$0xff] }
   0xc   :  { %542 = vmatpush3.msra.mxu0 %v47_v9  ;;  %573 = vmatpush3.msra.mxu1 %v143_v10  ;;  %v45_v13 = vld [vmem:[%s1066_s1 + $0x40] sm:$0xff]  ;;  %v141_v14 = vld [vmem:[%s1068_s3 + $0x50] sm:$0xff]  ;;  %v44_v15 = vld [vmem:[%s1066_s1 + $0x38] sm:$0xff] }
   0xd   :  { %543 = vmatprep.subr.mxu0 %v685_v1  ;;  %574 = vmatprep.subr.mxu1 %v685_v1  ;;  %v140_v16 = vld [vmem:[%s1068_s3 + $0x48] sm:$0xff]  ;;  %v43_v17 = vld [vmem:[%s1066_s1 + $0x30] sm:$0xff]  ;;  %v139_v18 = vld [vmem:[%s1068_s3 + $0x40] sm:$0xff] }
   0xe   :  { %544 = vmatpush3.msra.mxu0 %v46_v11  ;;  %575 = vmatpush3.msra.mxu1 %v142_v12  ;;  %v42_v19 = vld [vmem:[%s1066_s1 + $0x28] sm:$0xff]  ;;  %v138_v20 = vld [vmem:[%s1068_s3 + $0x38] sm:$0xff]  ;;  %v41_v21 = vld [vmem:[%s1066_s1 + $0x20] sm:$0xff] }
   0xf   :  { %545 = vmatprep.subr.mxu0 %v685_v1  ;;  %576 = vmatprep.subr.mxu1 %v685_v1  ;;  %v137_v22 = vld [vmem:[%s1068_s3 + $0x30] sm:$0xff]  ;;  %v40_v23 = vld [vmem:[%s1066_s1 + $0x18] sm:$0xff]  ;;  %v136_v24 = vld [vmem:[%s1068_s3 + $0x28] sm:$0xff] }
  0x10   :  { %546 = vmatpush3.msra.mxu0 %v45_v13  ;;  %577 = vmatpush3.msra.mxu1 %v141_v14  ;;  %v39_v25 = vld [vmem:[%s1066_s1 + $0x10] sm:$0xff]  ;;  %v135_v26 = vld [vmem:[%s1068_s3 + $0x20] sm:$0xff]  ;;  %v38_v27 = vld [vmem:[%s1066_s1 + $0x8] sm:$0xff] }
  0x11   :  { %547 = vmatprep.subr.mxu0 %v685_v1  ;;  %578 = vmatprep.subr.mxu1 %v685_v1  ;;  %v134_v28 = vld [vmem:[%s1068_s3 + $0x18] sm:$0xff]  ;;  %v37_v29 = vld [vmem:[%s1066_s1] sm:$0xff]  ;;  %v133_v31 = vld [vmem:[%s1068_s3 + $0x10] sm:$0xff] }
  0x12   :  { %548 = vmatpush3.msra.mxu0 %v44_v15  ;;  %579 = vmatpush3.msra.mxu1 %v140_v16  ;;  %v867_v30 = vld [vmem:[%s1065_s0] sm:$0x3]  ;;  %v132_v32 = vld [vmem:[%s1068_s3 + $0x8] sm:$0xff]  ;;  %v256_v34 = vld [vmem:[%s1070_s5 + $0xf8] sm:$0xff] }
  0x13   :  { %549 = vmatprep.subr.mxu0 %v685_v1  ;;  %580 = vmatprep.subr.mxu1 %v685_v1  ;;  %v131_v33 = vld [vmem:[%s1068_s3] sm:$0xff]  ;;  %v255_v35 = vld [vmem:[%s1070_s5 + $0xf0] sm:$0xff]  ;;  %v254_v36 = vld [vmem:[%s1070_s5 + $0xe8] sm:$0xff] }
  0x14   :  { %550 = vmatpush3.msra.mxu0 %v43_v17  ;;  %581 = vmatpush3.msra.mxu1 %v139_v18  ;;  %v253_v37 = vld [vmem:[%s1070_s5 + $0xe0] sm:$0xff]  ;;  %v252_v38 = vld [vmem:[%s1070_s5 + $0xd8] sm:$0xff]  ;;  %v251_v39 = vld [vmem:[%s1070_s5 + $0xd0] sm:$0xff] }
  0x15   :  { %551 = vmatprep.subr.mxu0 %v685_v1  ;;  %582 = vmatprep.subr.mxu1 %v685_v1  ;;  %v250_v40 = vld [vmem:[%s1070_s5 + $0xc8] sm:$0xff]  ;;  %v249_v41 = vld [vmem:[%s1070_s5 + $0xc0] sm:$0xff]  ;;  %v248_v42 = vld [vmem:[%s1070_s5 + $0xb8] sm:$0xff] }
  0x16   :  { %552 = vmatpush3.msra.mxu0 %v42_v19  ;;  %583 = vmatpush3.msra.mxu1 %v138_v20  ;;  %v247_v43 = vld [vmem:[%s1070_s5 + $0xb0] sm:$0xff]  ;;  %v246_v44 = vld [vmem:[%s1070_s5 + $0xa8] sm:$0xff]  ;;  %v245_v45 = vld [vmem:[%s1070_s5 + $0xa0] sm:$0xff] }
  0x17   :  { %553 = vmatprep.subr.mxu0 %v685_v1  ;;  %584 = vmatprep.subr.mxu1 %v685_v1  ;;  %v244_v46 = vld [vmem:[%s1070_s5 + $0x98] sm:$0xff]  ;;  %v243_v47 = vld [vmem:[%s1070_s5 + $0x90] sm:$0xff]  ;;  %v242_v48 = vld [vmem:[%s1070_s5 + $0x88] sm:$0xff] }
  0x18   :  { %554 = vmatpush3.msra.mxu0 %v41_v21  ;;  %585 = vmatpush3.msra.mxu1 %v137_v22  ;;  %v241_v49 = vld [vmem:[%s1070_s5 + $0x80] sm:$0xff]  ;;  %v240_v50 = vld [vmem:[%s1070_s5 + $0x78] sm:$0xff]  ;;  %v239_v51 = vld [vmem:[%s1070_s5 + $0x70] sm:$0xff] }
  0x19   :  { %555 = vmatprep.subr.mxu0 %v685_v1  ;;  %586 = vmatprep.subr.mxu1 %v685_v1  ;;  %v238_v52 = vld [vmem:[%s1070_s5 + $0x68] sm:$0xff]  ;;  %v237_v53 = vld [vmem:[%s1070_s5 + $0x60] sm:$0xff]  ;;  %v236_v54 = vld [vmem:[%s1070_s5 + $0x58] sm:$0xff] }
  0x1a   :  { %556 = vmatpush3.msra.mxu0 %v40_v23  ;;  %587 = vmatpush3.msra.mxu1 %v136_v24  ;;  %v235_v55 = vld [vmem:[%s1070_s5 + $0x50] sm:$0xff]  ;;  %v234_v56 = vld [vmem:[%s1070_s5 + $0x48] sm:$0xff]  ;;  %v233_v57 = vld [vmem:[%s1070_s5 + $0x40] sm:$0xff] }
  0x1b   :  { %557 = vmatprep.subr.mxu0 %v685_v1  ;;  %588 = vmatprep.subr.mxu1 %v685_v1  ;;  %v232_v58 = vld [vmem:[%s1070_s5 + $0x38] sm:$0xff]  ;;  %v231_v59 = vld [vmem:[%s1070_s5 + $0x30] sm:$0xff]  ;;  %v230_v60 = vld [vmem:[%s1070_s5 + $0x28] sm:$0xff] }
  0x1c   :  { %558 = vmatpush3.msra.mxu0 %v39_v25  ;;  %589 = vmatpush3.msra.mxu1 %v135_v26  ;;  %v477_v61 = vld [vmem:[%s1067_s2] ss:$0 sm:$0xff]  ;;  %v370_v3 = vld [vmem:[%s1072_s7 + $0x78] sm:$0xff]  ;;  %v369_v4 = vld [vmem:[%s1072_s7 + $0x70] sm:$0xff] }
  0x1d   :  { %559 = vmatprep.subr.mxu0 %v685_v1  ;;  %590 = vmatprep.subr.mxu1 %v685_v1  ;;  %v368_v5 = vld [vmem:[%s1072_s7 + $0x68] sm:$0xff]  ;;  %v367_v6 = vld [vmem:[%s1072_s7 + $0x60] sm:$0xff]  ;;  %v366_v7 = vld [vmem:[%s1072_s7 + $0x58] sm:$0xff] }
  0x1e   :  { %560 = vmatpush3.msra.mxu0 %v38_v27  ;;  %591 = vmatpush3.msra.mxu1 %v134_v28  ;;  %v365_v8 = vld [vmem:[%s1072_s7 + $0x50] sm:$0xff]  ;;  %v364_v9 = vld [vmem:[%s1072_s7 + $0x48] sm:$0xff]  ;;  %v363_v10 = vld [vmem:[%s1072_s7 + $0x40] sm:$0xff] }
  0x1f   :  { %561 = vmatprep.subr.mxu0 %v685_v1  ;;  %592 = vmatprep.subr.mxu1 %v685_v1  ;;  %v362_v11 = vld [vmem:[%s1072_s7 + $0x38] sm:$0xff]  ;;  %v361_v12 = vld [vmem:[%s1072_s7 + $0x30] sm:$0xff]  ;;  %v360_v13 = vld [vmem:[%s1072_s7 + $0x28] sm:$0xff] }
  0x20   :  { %562 = vmatpush3.msra.mxu0 %v37_v29  ;;  %593 = vmatpush3.msra.mxu1 %v133_v31  ;;  %v229_v14 = vld [vmem:[%s1070_s5 + $0x20] sm:$0xff]  ;;  %v228_v16 = vld [vmem:[%s1070_s5 + $0x18] sm:$0xff]  ;;  %v227_v17 = vld [vmem:[%s1070_s5 + $0x10] sm:$0xff] }
  0x21   :  { %564 = vmatmul.mubr.f32.vlgmr.msra.gmra.mxu0 %v867_v30  ;;  %594 = vmatprep.subr.mxu1 %v685_v1  ;;  %v359_v15 = vld [vmem:[%s1072_s7 + $0x20] sm:$0xff]  ;;  %v358_v18 = vld [vmem:[%s1072_s7 + $0x18] sm:$0xff]  ;;  %v226_v19 = vld [vmem:[%s1070_s5 + $0x8] sm:$0xff] }
  0x22   :  { %333 = vmatprep.mubr.f32.mxu0 %v685_v1  ;;  %595 = vmatpush3.msra.mxu1 %v132_v32  ;;  %v225_v20 = vld [vmem:[%s1070_s5] sm:$0xff]  ;;  %v357_v21 = vld [vmem:[%s1072_s7 + $0x10] sm:$0xff]  ;;  %v356_v22 = vld [vmem:[%s1072_s7 + $0x8] sm:$0xff] }
  0x23   :  { %596 = vmatprep.subr.mxu1 %v685_v1  ;;  %269 = vmatprep.subr.mxu0 %v256_v34  ;;  %v355_v23 = vld [vmem:[%s1072_s7] sm:$0xff]  ;;  %s687_s7 = smov [#allocation4]  }
  0x24   :  { %597 = vmatpush3.msra.mxu1 %v131_v33  ;;  %270 = vmatpush1.msra.mxu0 %v255_v35  ;;  %v478_v24 = vld [vmem:[%s1069_s4] ss:$0 sm:$0xff]  ;;  %s465_s24 = sshll.u32 %s687_s7, 4  ;;  %s466_s24 = int_to_ptr.vmem [resolvable:$true] %s465_s24 }
  0x25   :  { %601 = vmatprep.subr.mxu1 %v685_v1  ;;  %271 = vmatprep.subr.mxu0 %v254_v36  ;;  %v479_v31 = vld [vmem:[%s1073_s8] ss:$0 sm:$0xff]  ;;  %s641_s3 = scalar_lea.vmem %s466_s24, 32  ;;  %p646_p1 = scmp.lt.s32.totalorder %s466_s24, %s466_s24 }
  0x26   :  { %272 = vmatpush1.msra.mxu0 %v253_v37  ;;  %p642_p0 = scmp.ne.s32.totalorder %s466_s24, %s641_s3  ;;  %p647_p2 = scmp.lt.s32.totalorder %s641_s3, %s641_s3 }
  0x27   :  { %273 = vmatprep.subr.mxu0 %v252_v38 }
  0x28   :  { %274 = vmatpush1.msra.mxu0 %v251_v39  ;;  %p648_p3 = por %p647_p2, %p646_p1 }
  0x29   :  { %275 = vmatprep.subr.mxu0 %v250_v40 }
  0x2a   :  { %276 = vmatpush1.msra.mxu0 %v249_v41  ;;  %p649_p4 = pnand %p648_p3, %p642_p0 }
  0x2b   :  { %277 = vmatprep.subr.mxu0 %v248_v42 }
  0x2c   :  { %278 = vmatpush1.msra.mxu0 %v247_v43 }
  0x2d   :  { %279 = vmatprep.subr.mxu0 %v246_v44 }
  0x2e   :  { %280 = vmatpush1.msra.mxu0 %v245_v45 }
  0x2f   :  { %281 = vmatprep.subr.mxu0 %v244_v46 }
  0x30   :  { %282 = vmatpush1.msra.mxu0 %v243_v47 }
  0x31   :  { %283 = vmatprep.subr.mxu0 %v242_v48 }
  0x32   :  { %284 = vmatpush1.msra.mxu0 %v241_v49 }
  0x33   :  { %285 = vmatprep.subr.mxu0 %v240_v50 }
  0x34   :  { %286 = vmatpush1.msra.mxu0 %v239_v51 }
  0x35   :  { %287 = vmatprep.subr.mxu0 %v238_v52 }
  0x36   :  { %288 = vmatpush1.msra.mxu0 %v237_v53 }
  0x37   :  { %289 = vmatprep.subr.mxu0 %v236_v54 }
  0x38   :  { %290 = vmatpush1.msra.mxu0 %v235_v55 }
  0x39   :  { %291 = vmatprep.subr.mxu0 %v234_v56 }
  0x3a   :  { %292 = vmatpush1.msra.mxu0 %v233_v57 }
  0x3b   :  { %293 = vmatprep.subr.mxu0 %v232_v58 }
  0x3c   :  { %294 = vmatpush1.msra.mxu0 %v231_v59 }
  0x3d   :  { %295 = vmatprep.subr.mxu0 %v230_v60 }
  0x3e   :  { %296 = vmatpush1.msra.mxu0 %v229_v14 }
  0x3f   :  { %297 = vmatprep.subr.mxu0 %v228_v16 }
  0x40   :  { %298 = vmatpush1.msra.mxu0 %v227_v17 }
  0x41   :  { %299 = vmatprep.subr.mxu0 %v226_v19 }
  0x42   :  { %300 = vmatpush1.msra.mxu0 %v225_v20 }
  0xe1   :  { %v126_v62 = vpop.f32.mrf.mxu0 }
  0xe2   :  { %v127_v63 = vadd.f32 %v477_v61, %v126_v62 }
  0xe3   :  { %v565_v0 = vpop.f32.mrf.mxu0 }
  0xe4   :  { %v130_v2 = vmax.f32 %v127_v63, 0.0 }
  0xe6   :  { %599 = vmatmul.mubr.f32.vlgmr.msra.gmra.mxu1 %v130_v2 }
  0xe7   :  { %602 = vmatpush3.msra.mxu1 %v370_v3  ;;  %633 = vmatprep.mubr.msk.f32.mxu1 %vm686_vm0, %v685_v1 }
  0xe8   :  { %603 = vmatprep.subr.mxu1 %v685_v1 }
  0xe9   :  { %604 = vmatpush3.msra.mxu1 %v369_v4 }
  0xea   :  { %605 = vmatprep.subr.mxu1 %v685_v1 }
  0xeb   :  { %606 = vmatpush3.msra.mxu1 %v368_v5 }
  0xec   :  { %607 = vmatprep.subr.mxu1 %v685_v1 }
  0xed   :  { %608 = vmatpush3.msra.mxu1 %v367_v6 }
  0xee   :  { %609 = vmatprep.subr.mxu1 %v685_v1 }
  0xef   :  { %610 = vmatpush3.msra.mxu1 %v366_v7 }
  0xf0   :  { %611 = vmatprep.subr.mxu1 %v685_v1 }
  0xf1   :  { %612 = vmatpush3.msra.mxu1 %v365_v8 }
  0xf2   :  { %613 = vmatprep.subr.mxu1 %v685_v1 }
  0xf3   :  { %614 = vmatpush3.msra.mxu1 %v364_v9 }
  0xf4   :  { %615 = vmatprep.subr.mxu1 %v685_v1 }
  0xf5   :  { %616 = vmatpush3.msra.mxu1 %v363_v10 }
  0xf6   :  { %617 = vmatprep.subr.mxu1 %v685_v1 }
  0xf7   :  { %618 = vmatpush3.msra.mxu1 %v362_v11 }
  0xf8   :  { %619 = vmatprep.subr.mxu1 %v685_v1 }
  0xf9   :  { %620 = vmatpush3.msra.mxu1 %v361_v12 }
  0xfa   :  { %621 = vmatprep.subr.mxu1 %v685_v1 }
  0xfb   :  { %622 = vmatpush3.msra.mxu1 %v360_v13 }
  0xfc   :  { %623 = vmatprep.subr.mxu1 %v685_v1 }
  0xfd   :  { %624 = vmatpush3.msra.mxu1 %v359_v15 }
  0xfe   :  { %625 = vmatprep.subr.mxu1 %v685_v1 }
  0xff   :  { %626 = vmatpush3.msra.mxu1 %v358_v18 }
 0x100   :  { %627 = vmatprep.subr.mxu1 %v685_v1 }
 0x101   :  { %628 = vmatpush3.msra.mxu1 %v357_v21 }
 0x102   :  { %629 = vmatprep.subr.mxu1 %v685_v1 }
 0x103   :  { %630 = vmatpush3.msra.mxu1 %v356_v22 }
 0x104   :  { %631 = vmatprep.subr.mxu1 %v685_v1 }
 0x105   :  { %632 = vmatpush3.msra.mxu1 %v355_v23 }
 0x106   :  { %634 = vmatmul.mubr.f32.vlgmr.msra.gmra.mxu1 %v867_v30 }
 0x1a6   :  { %v220_v25 = vpop.f32.mrf.mxu1 }
 0x1a7   :  { %v221_v26 = vadd.f32 %v478_v24, %v220_v25 }
 0x1a8   :  { %v600_v27 = vpop.f32.mrf.mxu1 }
 0x1a9   :  { %v224_v28 = vmax.f32 %v221_v26, 0.0 }
 0x1ab   :  { %334 = vmatmul.mubr.f32.vlgmr.msra.gmra.mxu0 %v224_v28 }
 0x1c6   :  { %v444_v29 = vpop.f32.mrf.mxu1 }
 0x1c7   :  { %v445_v32 = vadd.f32 %v479_v31, %v444_v29 }
 0x1c8   :  { %v635_v33 = vpop.f32.mrf.mxu1 }
 0x1c9   :  { %448 = vst [vmem:[#allocation4] sm:$0x3] %v445_v32 }
 0x1ca   :  { %652 = shalt.err (!%p649_p4)
}
 0x1cb   :  { %468 = dma.vmem_to_hbm [thread:$0]  %s466_s24, 32, %s1075_s10, [#allocation5]   ;;  %v259_v1 = vlaneseq  ;;  %v688_v34 = vmov 1983009808   ;;  %v257_v38 = vld [vmem:[%s1071_s6] sm:$0x3] }
 0x1cc   :  { %v344_v35 = vunpack.c.l.s4 %v688_v34  ;;  %vm351_vm1 = vcmask 1041408   ;;  %vm352_vm2 = vcmask 519170   ;;  %s689_s10 = smov [#allocation2]  }
 0x1cd   :  { %v260_v30 = vshrl.u32 %v259_v1, 7  ;;  %s455_s27 = sshll.u32 %s689_s10, 4  ;;  %vm353_vm3 = vmor %vm352_vm2, %vm351_vm1  ;;  %s456_s27 = int_to_ptr.vmem [resolvable:$true] %s455_s27 }
 0x1ce   :  { %v345_v39 = vunpack.c.0.s8 %v344_v35  ;;  %s661_s28 = scalar_lea.vmem %s456_s27, 64  ;;  %p666_p6 = scmp.lt.s32.totalorder %s456_s27, %s456_s27 }
 0x1cf   :  { %v261_v36 = vsub.s32 0, %v260_v30  ;;  %v265_v37 = vsub.s32 1, %v260_v30  ;;  %p662_p5 = scmp.ne.s32.totalorder %s456_s27, %s661_s28  ;;  %p667_p7 = scmp.lt.s32.totalorder %s661_s28, %s661_s28 }
 0x1d0   :  { %v348_v44 = vsub.s32 %v345_v39, %v260_v30 }
 0x1d1   :  { %v262_v40 = vrot.slane %v257_v38, %v261_v36  ;;  %v266_v41 = vrot.slane %v257_v38, %v265_v37  ;;  %p668_p8 = por %p667_p7, %p666_p6 }
 0x1d3   :  { %p669_p9 = pnand %p668_p8, %p662_p5 }
 0x26b   :  { %v335_v42 = vpop.f32.mrf.mxu0 }
 0x26c   :  { %v336_v45 = vadd.f32 %v335_v42, %v262_v40 }
 0x26d   :  { %v337_v43 = vpop.f32.mrf.mxu0 }
 0x26e   :  { %v338_v46 = vadd.f32 %v337_v43, %v266_v41 }
 0x270   :  { %v342_v47 = vcombine.low %v336_v45, %v338_v46 }
 0x272   :  { %v349_v48 = vrot.slane %v342_v47, %v348_v44 }
 0x274   :  { %354 = vst.msk [vmem:[#allocation2] sm:$0xf] %vm353_vm3, %v349_v48 }
 0x275   :  { %672 = shalt.err (!%p669_p9)
}
 0x276   :  { %458 = dma.vmem_to_hbm [thread:$0]  %s456_s27, 64, %s1074_s9, [#allocation3]  }
 0x277   :  { %681 = dma.done.wait [#allocation3], 64  }
 0x278   :  { %682 = vsyncadd [#allocation3], 4294967232 }
 0x279   :  { %683 = dma.done.wait [#allocation5], 32  }
 0x27a   :  { %684 = vsyncadd [#allocation5], 4294967264 }
 0x27b   :  { %475 = vsyncpa [#allocation3], 1 }
 0x27c   :  { %476 = vsyncpa [#allocation5], 1 }

</bundles_post_ra>
